<compile_context>
chip_gen: v5e
topology: v5e:2x2
jax: 0.10.0
libtpu: 0.0.40
codegen_flags: <defaults>
</compile_context>

<pallas_src>
import jax
import jax.numpy as jnp
from jax.experimental import pallas as pl
from jax.experimental.pallas import tpu as pltpu

BN_EPS = 1e-5


def _round_up(x, mult):
    return ((x + mult - 1) // mult) * mult


def conv_stats_kernel(xcol_ref, w_ref, conv_ref, stats_ref):
    # xcol_ref: (TM, Kpad) bf16   folded im2col tile (K^3*Cin padded to 128)
    # w_ref:    (Kpad, Cpad) bf16 folded weights
    # conv_ref: (TM, Cpad) f32    conv output tile
    # stats_ref:(2, Cpad)  f32    per-tile [sum; sum of squares] over rows
    acc = jnp.dot(xcol_ref[...], w_ref[...], preferred_element_type=jnp.float32)
    conv_ref[...] = acc
    s = jnp.sum(acc, axis=0, keepdims=True)            # (1, Cpad)
    sq = jnp.sum(acc * acc, axis=0, keepdims=True)     # (1, Cpad)
    stats_ref[...] = jnp.concatenate([s, sq], axis=0)  # (2, Cpad)


def affine_relu_kernel(y_ref, scale_ref, shift_ref, o_ref):
    # y_ref: (TM, Cpad) f32; scale/shift: (1, Cpad) f32 fused BN affine
    o_ref[...] = jnp.maximum(y_ref[...] * scale_ref[...] + shift_ref[...], 0.0)


def conv_bn_relu_3d(x_ncdhw, weight, bias, gamma, beta, pad=1, tile_m=512):
    """x_ncdhw: (N, Cin, D, H, W); weight: (Cout, Cin, KD, KH, KW) (PyTorch layout).

    `bias` is accepted for interface parity but is mathematically cancelled by the
    training-mode BatchNorm mean subtraction, so it is not applied.
    """
    n, cin, d, h, w = x_ncdhw.shape
    cout = weight.shape[0]
    kd, kh, kw = weight.shape[2:]
    k3 = kd * kh * kw
    m = n * d * h * w

    # ---- glue: channels-last + spatial zero-pad + im2col folded to (M, K^3*Cin) ----
    # TODO(synk): replace the HBM im2col (K^3 read amplification) with in-kernel
    # halo tiling of the padded NDHWC tensor; kept here since the GEMM/BN structure
    # is unchanged by it.
    x_cl = jnp.transpose(x_ncdhw, (0, 2, 3, 4, 1)).astype(jnp.float32)      # NDHWC
    x_p = jnp.pad(x_cl, ((0, 0), (pad, pad), (pad, pad), (pad, pad), (0, 0)))
    taps = []
    for a in range(kd):
        for b in range(kh):
            for c in range(kw):
                taps.append(x_p[:, a:a + d, b:b + h, c:c + w, :].reshape(m, cin))
    xcol = jnp.concatenate(taps, axis=1)                                    # (M, K3*Cin)

    kdim = k3 * cin
    kpad = _round_up(kdim, 128)            # contraction depth -> full MXU lanes
    cpad = _round_up(cout, 128)            # lane-dense output channels
    tm = min(tile_m, _round_up(m, 8))
    m_pad = _round_up(m, tm)
    ntiles = m_pad // tm

    # bf16 GEMM operands (MXU-native), fp32 accumulation.  Zero-padded rows/cols
    # contribute exactly 0 to the GEMM and to the BN sums (no bias added).
    xcol_p = jnp.pad(xcol, ((0, m_pad - m), (0, kpad - kdim))).astype(jnp.bfloat16)
    w_flat = jnp.transpose(weight, (2, 3, 4, 1, 0)).reshape(kdim, cout).astype(jnp.float32)
    w_p = jnp.pad(w_flat, ((0, kpad - kdim), (0, cpad - cout))).astype(jnp.bfloat16)

    # ---- pass 1: tiled GEMM + per-tile per-channel sum / sum-of-squares ----
    conv_out, partial_stats = pl.pallas_call(
        conv_stats_kernel,
        out_shape=(
            jax.ShapeDtypeStruct((m_pad, cpad), jnp.float32),
            jax.ShapeDtypeStruct((ntiles, 2, cpad), jnp.float32),
        ),
        grid=(ntiles,),
        in_specs=[
            pl.BlockSpec((tm, kpad), lambda i: (i, 0)),
            pl.BlockSpec((kpad, cpad), lambda i: (0, 0)),
        ],
        out_specs=(
            pl.BlockSpec((tm, cpad), lambda i: (i, 0)),
            pl.BlockSpec((None, 2, cpad), lambda i: (i, 0, 0)),
        ),
        compiler_params=pltpu.CompilerParams(
            dimension_semantics=("parallel",)),
    )(xcol_p, w_p)

    # ---- BN finalize (tiny per-channel math): fused scale / shift ----
    stats = jnp.sum(partial_stats, axis=0)                     # (2, Cpad)
    mean = stats[0] / m
    var = jnp.maximum(stats[1] / m - mean * mean, 0.0)         # biased variance
    gamma_p = jnp.pad(gamma.astype(jnp.float32), (0, cpad - cout))
    beta_p = jnp.pad(beta.astype(jnp.float32), (0, cpad - cout))
    scale_row = gamma_p * jax.lax.rsqrt(var + BN_EPS)
    shift_row = beta_p - mean * scale_row
    scale = scale_row.reshape(1, cpad)
    shift = shift_row.reshape(1, cpad)

    # ---- pass 2: tiled affine + ReLU (lane-dense, fully parallel) ----
    out_pad = pl.pallas_call(
        affine_relu_kernel,
        out_shape=jax.ShapeDtypeStruct((m_pad, cpad), jnp.float32),
        grid=(ntiles,),
        in_specs=[
            pl.BlockSpec((tm, cpad), lambda i: (i, 0)),
            pl.BlockSpec((1, cpad), lambda i: (0, 0)),
            pl.BlockSpec((1, cpad), lambda i: (0, 0)),
        ],
        out_specs=pl.BlockSpec((tm, cpad), lambda i: (i, 0)),
        compiler_params=pltpu.CompilerParams(
            dimension_semantics=("parallel",)),
    )(conv_out, scale, shift)

    out = out_pad[:m, :cout].reshape(n, d, h, w, cout)
    return jnp.transpose(out, (0, 4, 1, 2, 3))                 # back to NCDHW


def reference(x_ncdhw, weight, bias, gamma, beta, pad=1):
    """Pure-JAX reference: conv3d (bf16 operands, f32 accumulate, matching MXU
    precision) + training-mode BN + ReLU (PyTorch semantics)."""
    y = jax.lax.conv_general_dilated(
        x_ncdhw.astype(jnp.bfloat16),
        weight.astype(jnp.bfloat16),
        window_strides=(1, 1, 1),
        padding=[(pad, pad)] * 3,
        dimension_numbers=("NCDHW", "OIDHW", "NCDHW"),
        preferred_element_type=jnp.float32,
    ) + bias.reshape(1, -1, 1, 1, 1).astype(jnp.float32)
    mean = jnp.mean(y, axis=(0, 2, 3, 4), keepdims=True)
    var = jnp.mean(jnp.square(y - mean), axis=(0, 2, 3, 4), keepdims=True)
    y = (y - mean) * jax.lax.rsqrt(var + BN_EPS)
    y = y * gamma.reshape(1, -1, 1, 1, 1) + beta.reshape(1, -1, 1, 1, 1)
    return jnp.maximum(y, 0.0)


if __name__ == "__main__":
    key = jax.random.PRNGKey(0)
    k_x, k_w, k_b, k_g, k_be = jax.random.split(key, 5)

    N, CIN, COUT, D, H, W, K = 2, 4, 8, 8, 8, 8, 3

    x = jax.random.normal(k_x, (N, CIN, D, H, W), jnp.float32)
    # Conv3d params (PyTorch shapes): weight (Cout, Cin, K, K, K), bias (Cout,)
    weight = jax.random.normal(k_w, (COUT, CIN, K, K, K), jnp.float32) * 0.1
    bias = jax.random.normal(k_b, (COUT,), jnp.float32) * 0.1
    # BatchNorm3d affine params (Cout,)
    gamma = 1.0 + 0.1 * jax.random.normal(k_g, (COUT,), jnp.float32)
    beta = 0.1 * jax.random.normal(k_be, (COUT,), jnp.float32)

    out = jax.block_until_ready(conv_bn_relu_3d(x, weight, bias, gamma, beta))
    ref = jax.block_until_ready(reference(x, weight, bias, gamma, beta))

    assert out.shape == (N, COUT, D, H, W), out.shape
    assert jnp.allclose(out, ref, atol=2e-3, rtol=2e-3), float(
        jnp.max(jnp.abs(out - ref))
    )
    print("KERNEL_OK")
</pallas_src>

<mosaic_0001>
module attributes {stable_mosaic.version = 11 : i64} {
  func.func @conv_stats_kernel(%arg0: i32, %arg1: memref<512x128xbf16, #tpu.memory_space<vmem>>, %arg2: memref<128x128xbf16, #tpu.memory_space<vmem>>, %arg3: memref<512x128xf32, #tpu.memory_space<vmem>>, %arg4: memref<1x2x128xf32, #tpu.memory_space<vmem>>) attributes {dimension_semantics = [#tpu.dimension_semantics<parallel>], iteration_bounds = array<i64: 2>, scalar_prefetch = 0 : i64, scratch_operands = 0 : i64, tpu.core_type = #tpu.core_type<tc>, window_params = [{transform_indices = @transform_0, window_bounds = array<i64: 512, 128>}, {pipeline_mode = #tpu.pipeline_mode<synchronous>, transform_indices = @transform_1, window_bounds = array<i64: 128, 128>}, {transform_indices = @transform_2, window_bounds = array<i64: 512, 128>}, {transform_indices = @transform_3, window_bounds = array<i64: 1, 2, 128>}]} {
    %c0 = arith.constant 0 : index
    %c0_0 = arith.constant 0 : index
    %0 = vector.load %arg1[%c0, %c0_0] : memref<512x128xbf16, #tpu.memory_space<vmem>>, vector<512x128xbf16>
    %c0_1 = arith.constant 0 : index
    %c0_2 = arith.constant 0 : index
    %1 = vector.load %arg2[%c0_1, %c0_2] : memref<128x128xbf16, #tpu.memory_space<vmem>>, vector<128x128xbf16>
    %cst = arith.constant dense<0.000000e+00> : vector<512x128xf32>
    %2 = tpu.matmul %0, %1, %cst {dimension_numbers = #tpu.dot_dimension_numbers<[1], [0], [0], [1], [0, 0, 1, 1], [], []>} : vector<512x128xbf16>, vector<128x128xbf16>, vector<512x128xf32> -> vector<512x128xf32>
    %c0_3 = arith.constant 0 : index
    %c0_4 = arith.constant 0 : index
    %3 = vector.load %arg3[%c0_3, %c0_4] : memref<512x128xf32, #tpu.memory_space<vmem>>, vector<512x128xf32>
    tpu.vector_store %arg3[%c0_3, %c0_4], %2 {strides = array<i32>} : memref<512x128xf32, #tpu.memory_space<vmem>>, vector<512x128xf32>,
    %cst_5 = arith.constant dense<0.000000e+00> : vector<128xf32>
    %4 = vector.multi_reduction <add>, %2, %cst_5 [0] : vector<512x128xf32> to vector<128xf32>
    %5 = vector.shape_cast %4 : vector<128xf32> to vector<1x128xf32>
    %6 = arith.mulf %2, %2 : vector<512x128xf32>
    %cst_6 = arith.constant dense<0.000000e+00> : vector<128xf32>
    %7 = vector.multi_reduction <add>, %6, %cst_6 [0] : vector<512x128xf32> to vector<128xf32>
    %8 = vector.shape_cast %7 : vector<128xf32> to vector<1x128xf32>
    %9 = tpu.concatenate %5, %8 in 0 : vector<1x128xf32>, vector<1x128xf32> -> vector<2x128xf32>
    %c0_7 = arith.constant 0 : index
    %c0_8 = arith.constant 0 : index
    %c0_9 = arith.constant 0 : index
    %10 = vector.load %arg4[%c0_7, %c0_8, %c0_9] : memref<1x2x128xf32, #tpu.memory_space<vmem>>, vector<1x2x128xf32>
    %11 = vector.shape_cast %10 : vector<1x2x128xf32> to vector<2x128xf32>
    %12 = vector.shape_cast %9 : vector<2x128xf32> to vector<1x2x128xf32>
    tpu.vector_store %arg4[%c0_7, %c0_8, %c0_9], %12 {strides = array<i32>} : memref<1x2x128xf32, #tpu.memory_space<vmem>>, vector<1x2x128xf32>,
    return
  }
  func.func @transform_0(%arg0: i32) -> (i32, i32) {
    %c0_i32 = arith.constant 0 : i32
    %c0_i32_0 = arith.constant 0 : i32
    return %arg0, %c0_i32 : i32, i32
  }
  func.func @transform_1(%arg0: i32) -> (i32, i32) {
    %c0_i32 = arith.constant 0 : i32
    %c0_i32_0 = arith.constant 0 : i32
    %c0_i32_1 = arith.constant 0 : i32
    return %c0_i32, %c0_i32_0 : i32, i32
  }
  func.func @transform_2(%arg0: i32) -> (i32, i32) {
    %c0_i32 = arith.constant 0 : i32
    %c0_i32_0 = arith.constant 0 : i32
    return %arg0, %c0_i32 : i32, i32
  }
  func.func @transform_3(%arg0: i32) -> (i32, i32, i32) {
    %c0_i32 = arith.constant 0 : i32
    %c0_i32_0 = arith.constant 0 : i32
    %c0_i32_1 = arith.constant 0 : i32
    return %arg0, %c0_i32, %c0_i32_0 : i32, i32, i32
  }
}

</mosaic_0001>

<bundles_post_ra>
// kernel: tpu_custom_call.1
= control target key start
LH: loop header
LB: loop body
LE: loop exit
PB: predicated region body
PF: predicated region fallthrough
CT: control target
= control target key end

     0   :  { %9 = vsyncpa [#allocation3], 0  ;;  %s2189_s0 = inlined_call_operand.hbm [shape: bf16[1024,128], index: 0, kind: input, shape index: {}]   ;;  %s2190_s1 = inlined_call_operand.hbm [shape: bf16[128,128], index: 1, kind: input, shape index: {}]   ;;  %s2191_s2 = inlined_call_operand.hbm [shape: f32[1024,128], index: 2, kind: output, shape index: {0}]   ;;  %s2192_s3 = inlined_call_operand.hbm [shape: f32[2,2,128], index: 3, kind: output, shape index: {1}]  }
   0x1   :  { %11 = vsyncpa [#allocation3 + $0x1], 0 }
   0x2   :  { %12 = vsyncpa [#allocation6], 0 }
   0x3   :  { %13 = vsyncpa [#allocation4], 0 }
   0x4   :  { %15 = vsyncpa [#allocation4 + $0x1], 0 }
   0x5   :  { %16 = vsyncpa [#allocation9], 0 }
   0x6   :  { %18 = vsyncpa [#allocation9 + $0x1], 0  ;;  %s1630_s12 = smov 0   ;;  %s1632_s13 = smov 0  }
   0x7   :  { %s1634_s14 = smov 0   ;;  %s1636_s15 = smov 0  }
   0x8 LB: > { %s1651_s16 = sadd.s32 4294967295, %s1603_s15   ;;  %s1130_s17 = sadd.s32 4294967294, %s1603_s15   ;;  %s1603_s15 = sphi %s1636_s15, %s2202_s15   ;;  %s1599_s14 = sphi %s1634_s14, %s2201_s14   ;;  %s1595_s13 = sphi %s1632_s13, %s2200_s13   ;;  %s1591_s12 = sphi %s1630_s12, %s2199_s12  }
   0x9   : > { %p44_p0 = scmp.ne.s32.totalorder %s1595_s13, %s1591_s12  ;;  %p45_p1 = scmp.eq.s32.totalorder %s1651_s16, 0 }
   0xa   : > { %p89_p2 = scmp.eq.s32.totalorder %s1651_s16, 1  ;;  %p95_p3 = scmp.eq.s32.totalorder %s1130_s17, 1 }
   0xb   : > { %p1660_p4 = por %p45_p1, %p44_p0  ;;  %p1131_p5 = scmp.ge.s32.totalorder %s1603_s15, 1 }
   0xc   : > { %p1665_p6 = por %p95_p3, %p44_p0  ;;  %p128_p7 = scmp.lt.s32.totalorder %s1603_s15, 3 }
   0xd   : > { %s139_s22 = sshll.u32 %s2190_s1, 4  ;;  %s1605_s24 = smov [#allocation5]   ;;  %s140_s22 = int_to_ptr.hbm [resolvable:$true] %s139_s22 }
   0xe   : > { %p1673_p8 = pnand %p1131_p5, %p128_p7  ;;  %s141_s25 = sshll.u32 %s1605_s24, 4  ;;  %s142_s25 = int_to_ptr.vmem [resolvable:$true] %s141_s25 }
   0xf   : > { %s1683_s26 = sadd.s32 1, %s1603_s15   ;;  %s1606_s27 = smov 64  }
  0x10   : > { %p1385_p9 = pneg %p1673_p8  ;;  %s1607_s28 = smov 4  }
  0x11   : > { %s28_s29 = ssub.s32 %s1603_s15, %s1683_s26  ;;  %s31_s30 = sadd.s32 1, %s1599_s14 }
  0x12   : > { %p1386_p10 = pnand %p1385_p9, %p45_p1  ;;  %p29_p12 = scmp.eq.s32.totalorder %s28_s29, 0 }
  0x13   : > { %p38_p13 = scmp.ne.s32.totalorder %s1599_s14, %s1595_s13  ;;  %p39_p0 = scmp.eq.s32.totalorder %s1603_s15, 0 }
  0x14   : > { %1388 = dma.hbm_to_vmem [thread:$0]  (!%p1386_p10), %s140_s22, 1024, %s142_s25, [#allocation6], %s1606_s27, %s1606_s27, %s1607_s28  }
  0x15   : > { %s1695_s4 = scalar_select %p29_p12, %s1599_s14, %s31_s30  }
  0x16   : > { %p1699_p3 = por %p89_p2, %p38_p13  ;;  %p1401_p5 = scmp.lt.s32.totalorder %s1603_s15, 2 }
  0x17   : > { %s155_s6 = sand.u32 1, %s1599_s14   ;;  %s1309_s7 = sshll.u32 %s1603_s15, 8 }
  0x18   : > { %p40_p7 = por %p39_p0, %p38_p13  ;;  %s1134_s8 = sshll.u32 %s155_s6, 8 }
  0x19   : > { %s164_s11 = scalar_lea.hbm %s2189_s0, %s1309_s7  ;;  %s159_s20 = scalar_lea.vmem [#allocation2], %s1134_s8 }
  0x1a   : > { %s165_s17 = sshll.u32 %s164_s11, 4  ;;  %s167_s21 = sshll.u32 %s159_s20, 4  ;;  %s166_s17 = int_to_ptr.hbm [resolvable:$true] %s165_s17  ;;  %s168_s21 = int_to_ptr.vmem [resolvable:$true] %s167_s21 }
  0x1b   : > { %p1709_p9 = pnand %p1401_p5, %p40_p7  ;;  %s156_s24 = scalar_lea.sflag [#allocation3], %s155_s6 }
  0x1c   : > { %s1471_s25 = sshra.s32 %s166_s17, 4  ;;  %s1478_s8 = scalar_lea.hbm %s2189_s0, 512  ;;  %s1472_s25 = int_to_ptr.hbm [resolvable:$true] %s1471_s25 }
  0x1d   : > { %s1473_s29 = scalar_lea.hbm %s1472_s25, 256  ;;  %p1475_p10 = pneg %p1709_p9 }
  0x1e   : > { %p1474_p2 = scmp.ne.s32.totalorder %s1472_s25, %s1473_s29  ;;  %p1479_p0 = scmp.lt.s32.totalorder %s1472_s25, %s2189_s0 }
  0x1f   : > { %p1480_p5 = scmp.lt.s32.totalorder %s1478_s8, %s1473_s29 }
  0x20   : > { %p1476_p12 = pnand %p1475_p10, %p1474_p2 }
  0x21   : > { %p1481_p7 = por %p1480_p5, %p1479_p0 }
  0x22   : > { %p1477_p13 = pneg %p1476_p12 }
  0x24   : > { %p1482_p11 = pnand %p1481_p7, %p1477_p13 }
  0x26   : > { %1485 = shalt.err (!%p1482_p11)
}
  0x27   : > { %1392 = dma.hbm_to_vmem [thread:$0]  (!%p1709_p9), %s166_s17, 4096, %s168_s21, %s156_s24, %s1606_s27, %s1606_s27, %s1607_s28  }
  0x28   : > { %179 = sbr.rel (%p1673_p8) target bundleno = 442 (0x1ba), region = 28  ;;  %s1729_s6 = sand.u32 (!%p1673_p8), 1, %s1595_s13  }
  0x29   : > { %s1138_s11 = sshll.u32 (!%p1673_p8), %s1729_s6, 8  ;;  %s182_s20 = scalar_lea.sflag (!%p1673_p8), [#allocation3], %s1729_s6 }
  0x2a   : > { %s1733_s25 = scalar_lea.vmem (!%p1673_p8), [#allocation2], %s1138_s11 }
  0x2d   : > { %1574 = dma.done.wait (%p1660_p4), %s182_s20, 4096  }
  0x2e   : > { %1576 = vsyncadd (%p1660_p4), %s182_s20, 4294963200 }
  0x2f   : > { %1578 = dma.done.wait (%p45_p1), [#allocation6], 1024  }
  0x30   : > { %1580 = vsyncadd (%p45_p1), [#allocation6], 4294966272  ;;  %v1349_v0 = vld [vmem:[#allocation5 + $0x38] sm:$0xff]  ;;  %v1348_v1 = vld [vmem:[#allocation5 + $0x30] sm:$0xff]  ;;  %s1140_s18 = sshll.u32 %s1729_s6, 9  ;;  %s1350_s27 = sshll.u32 %s1651_s16, 9 }
  0x31   : > { %541 = vmatpush.bf16.msra.mxu0 %v1349_v0  ;;  %1351 = vmatpush.bf16.msra.mxu1 %v1349_v0  ;;  %v1347_v2 = vld [vmem:[#allocation5 + $0x28] sm:$0xff]  ;;  %v1346_v3 = vld [vmem:[#allocation5 + $0x20] sm:$0xff]  ;;  %v1345_v4 = vld [vmem:[#allocation5 + $0x18] sm:$0xff]  ;;  %s1774_s23 = scalar_lea.vmem [#allocation7], %s1140_s18  ;;  %s996_s21 = scalar_lea.hbm %s2191_s2, %s1350_s27 }
  0x32   : > { %1352 = vmatpush.bf16.msra.mxu2 %v1349_v0  ;;  %1353 = vmatpush.bf16.msra.mxu3 %v1349_v0  ;;  %v1344_v5 = vld [vmem:[#allocation5 + $0x10] sm:$0xff]  ;;  %v1343_v6 = vld [vmem:[#allocation5 + $0x8] sm:$0xff]  ;;  %v1342_v7 = vld [vmem:[#allocation5] sm:$0xff]  ;;  %s997_s22 = sshll.u32 %s1774_s23, 4  ;;  %s999_s24 = sshll.u32 %s996_s21, 4  ;;  %s2074_s22 = int_to_ptr.vmem [resolvable:$true] %s997_s22  ;;  %s1000_s24 = int_to_ptr.hbm [resolvable:$true] %s999_s24 }
  0x33   : > { %v1310_v8 = vld [vmem:[%s1733_s25] sm:$0xff]  ;;  %v1311_v10 = vld [vmem:[%s1733_s25 + $0x8] sm:$0xff]  ;;  %v1312_v13 = vld [vmem:[%s1733_s25 + $0x10] sm:$0xff]  ;;  %s980_s29 = scalar_lea.sflag [#allocation4], %s1729_s6  ;;  %s1515_s30 = sshra.s32 %s1000_s24, 4  ;;  %s1516_s30 = int_to_ptr.hbm [resolvable:$true] %s1515_s30 }
  0x34   : > { %v1318_v9 = vld [vmem:[%s1733_s25 + $0x40] sm:$0xff]  ;;  %v1319_v11 = vld [vmem:[%s1733_s25 + $0x48] sm:$0xff]  ;;  %v1320_v14 = vld [vmem:[%s1733_s25 + $0x50] sm:$0xff]  ;;  %s1517_s7 = scalar_lea.hbm %s1516_s30, 512  ;;  %s1521_s10 = scalar_lea.hbm %s2191_s2, 1024 }
  0x35   : > { %542 = vmatpush.bf16.msra.mxu0 %v1348_v1  ;;  %1354 = vmatpush.bf16.msra.mxu1 %v1348_v1  ;;  %v1326_v12 = vld [vmem:[%s1733_s25 + $0x80] sm:$0xff]  ;;  %v1327_v15 = vld [vmem:[%s1733_s25 + $0x88] sm:$0xff]  ;;  %v1313_v16 = vld [vmem:[%s1733_s25 + $0x18] sm:$0xff]  ;;  %p1518_p1 = scmp.ne.s32.totalorder %s1516_s30, %s1517_s7  ;;  %p1522_p11 = scmp.lt.s32.totalorder %s1516_s30, %s2191_s2 }
  0x36   : > { %1355 = vmatpush.bf16.msra.mxu2 %v1348_v1  ;;  %1356 = vmatpush.bf16.msra.mxu3 %v1348_v1  ;;  %v1321_v17 = vld [vmem:[%s1733_s25 + $0x58] sm:$0xff]  ;;  %v1328_v18 = vld [vmem:[%s1733_s25 + $0x90] sm:$0xff]  ;;  %v1334_v19 = vld [vmem:[%s1733_s25 + $0xc0] sm:$0xff]  ;;  %p1523_p9 = scmp.lt.s32.totalorder %s1521_s10, %s1517_s7 }
  0x37   : > { %v1314_v20 = vld [vmem:[%s1733_s25 + $0x20] sm:$0xff]  ;;  %v1329_v22 = vld [vmem:[%s1733_s25 + $0x98] sm:$0xff]  ;;  %v1335_v23 = vld [vmem:[%s1733_s25 + $0xc8] sm:$0xff]  ;;  %p1519_p4 = pnand %p1518_p1, %p1699_p3 }
  0x38   : > { %v1322_v21 = vld [vmem:[%s1733_s25 + $0x60] sm:$0xff]  ;;  %v1315_v24 = vld [vmem:[%s1733_s25 + $0x28] sm:$0xff]  ;;  %v1336_v27 = vld [vmem:[%s1733_s25 + $0xd0] sm:$0xff]  ;;  %p1524_p2 = por %p1523_p9, %p1522_p11 }
  0x39   : > { %543 = vmatpush.bf16.msra.mxu0 %v1347_v2  ;;  %1357 = vmatpush.bf16.msra.mxu1 %v1347_v2  ;;  %v1323_v25 = vld [vmem:[%s1733_s25 + $0x68] sm:$0xff]  ;;  %v1330_v26 = vld [vmem:[%s1733_s25 + $0xa0] sm:$0xff]  ;;  %v1316_v28 = vld [vmem:[%s1733_s25 + $0x30] sm:$0xff]  ;;  %p1520_p8 = pneg %p1519_p4 }
  0x3a   : > { %1358 = vmatpush.bf16.msra.mxu2 %v1347_v2  ;;  %1359 = vmatpush.bf16.msra.mxu3 %v1347_v2  ;;  %v1324_v29 = vld [vmem:[%s1733_s25 + $0x70] sm:$0xff]  ;;  %v1331_v30 = vld [vmem:[%s1733_s25 + $0xa8] sm:$0xff]  ;;  %v1337_v31 = vld [vmem:[%s1733_s25 + $0xd8] sm:$0xff] }
  0x3b   : > { %v1317_v32 = vld [vmem:[%s1733_s25 + $0x38] sm:$0xff]  ;;  %v1332_v34 = vld [vmem:[%s1733_s25 + $0xb0] sm:$0xff]  ;;  %v1338_v35 = vld [vmem:[%s1733_s25 + $0xe0] sm:$0xff]  ;;  %p1525_p10 = pnand %p1524_p2, %p1520_p8 }
  0x3c   : > { %v1325_v33 = vld [vmem:[%s1733_s25 + $0x78] sm:$0xff]  ;;  %v1339_v39 = vld [vmem:[%s1733_s25 + $0xe8] sm:$0xff]  ;;  %v1340_v51 = vld [vmem:[%s1733_s25 + $0xf0] sm:$0xff] }
  0x3d   : > { %544 = vmatpush.bf16.msra.mxu0 %v1346_v3  ;;  %1360 = vmatpush.bf16.msra.mxu1 %v1346_v3  ;;  %v1333_v38 = vld [vmem:[%s1733_s25 + $0xb8] sm:$0xff] }
  0x3e   : > { %1361 = vmatpush.bf16.msra.mxu2 %v1346_v3  ;;  %1362 = vmatpush.bf16.msra.mxu3 %v1346_v3  ;;  %v1341_v0 = vld [vmem:[%s1733_s25 + $0xf8] sm:$0xff] }
  0x41   : > { %545 = vmatpush.bf16.msra.mxu0 %v1345_v4  ;;  %1363 = vmatpush.bf16.msra.mxu1 %v1345_v4 }
  0x42   : > { %1364 = vmatpush.bf16.msra.mxu2 %v1345_v4  ;;  %1365 = vmatpush.bf16.msra.mxu3 %v1345_v4 }
  0x45   : > { %546 = vmatpush.bf16.msra.mxu0 %v1344_v5  ;;  %1366 = vmatpush.bf16.msra.mxu1 %v1344_v5 }
  0x46   : > { %1367 = vmatpush.bf16.msra.mxu2 %v1344_v5  ;;  %1368 = vmatpush.bf16.msra.mxu3 %v1344_v5 }
  0x49   : > { %547 = vmatpush.bf16.msra.mxu0 %v1343_v6  ;;  %1369 = vmatpush.bf16.msra.mxu1 %v1343_v6 }
  0x4a   : > { %1370 = vmatpush.bf16.msra.mxu2 %v1343_v6  ;;  %1371 = vmatpush.bf16.msra.mxu3 %v1343_v6 }
  0x4d   : > { %548 = vmatpush.bf16.msra.mxu0 %v1342_v7  ;;  %1372 = vmatpush.bf16.msra.mxu1 %v1342_v7 }
  0x4e   : > { %1373 = vmatpush.bf16.msra.mxu2 %v1342_v7  ;;  %1374 = vmatpush.bf16.msra.mxu3 %v1342_v7 }
  0x50   : > { %549 = vmatmul.bf16.vlgmr.msra.gmra.mxu0 %v1310_v8  ;;  %589 = vmatmul.bf16.vlgmr.msra.gmra.mxu1 %v1318_v9 }
  0x51   : > { %629 = vmatmul.bf16.vlgmr.msra.gmra.mxu2 %v1326_v12  ;;  %669 = vmatmul.bf16.vlgmr.msra.gmra.mxu3 %v1334_v19 }
  0x60   : > { %554 = vmatmul.bf16.gmra.mxu0 %v1311_v10  ;;  %594 = vmatmul.bf16.gmra.mxu1 %v1319_v11 }
  0x61   : > { %634 = vmatmul.bf16.gmra.mxu2 %v1327_v15  ;;  %674 = vmatmul.bf16.gmra.mxu3 %v1335_v23 }
  0x70   : > { %559 = vmatmul.bf16.gmra.mxu0 %v1312_v13  ;;  %599 = vmatmul.bf16.gmra.mxu1 %v1320_v14 }
  0x71   : > { %639 = vmatmul.bf16.gmra.mxu2 %v1328_v18  ;;  %679 = vmatmul.bf16.gmra.mxu3 %v1336_v27 }
  0x80   : > { %564 = vmatmul.bf16.gmra.mxu0 %v1313_v16  ;;  %604 = vmatmul.bf16.gmra.mxu1 %v1321_v17 }
  0x81   : > { %644 = vmatmul.bf16.gmra.mxu2 %v1329_v22  ;;  %684 = vmatmul.bf16.gmra.mxu3 %v1337_v31 }
  0x90   : > { %569 = vmatmul.bf16.gmra.mxu0 %v1314_v20  ;;  %609 = vmatmul.bf16.gmra.mxu1 %v1322_v21 }
  0x91   : > { %649 = vmatmul.bf16.gmra.mxu2 %v1330_v26  ;;  %689 = vmatmul.bf16.gmra.mxu3 %v1338_v35 }
  0xa0   : > { %574 = vmatmul.bf16.gmra.mxu0 %v1315_v24  ;;  %614 = vmatmul.bf16.gmra.mxu1 %v1323_v25 }
  0xa1   : > { %654 = vmatmul.bf16.gmra.mxu2 %v1331_v30  ;;  %694 = vmatmul.bf16.gmra.mxu3 %v1339_v39 }
  0xb0   : > { %579 = vmatmul.bf16.gmra.mxu0 %v1316_v28  ;;  %619 = vmatmul.bf16.gmra.mxu1 %v1324_v29 }
  0xb1   : > { %659 = vmatmul.bf16.gmra.mxu2 %v1332_v34  ;;  %699 = vmatmul.bf16.gmra.mxu3 %v1340_v51 }
  0xc0   : > { %584 = vmatmul.bf16.gmra.mxu0 %v1317_v32  ;;  %624 = vmatmul.bf16.gmra.mxu1 %v1325_v33 }
  0xc1   : > { %664 = vmatmul.bf16.gmra.mxu2 %v1333_v38  ;;  %704 = vmatmul.bf16.gmra.mxu3 %v1341_v0 }
  0xcd   : > { %v550_v36 = vpop.f32.mrf.mxu0  ;;  %v1772_v37 = vpop.f32.mrf.mxu1 }
  0xce   : > { %710 = vst [vmem:[%s1774_s23] sm:$0xff] %v550_v36  ;;  %v843_v42 = vmul.f32 %v550_v36, %v550_v36 }
  0xcf   : > { %726 = vst [vmem:[%s1774_s23 + $0x80] sm:$0xff] %v1772_v37 }
  0xd4   : > { %v1795_v56 = vpop.f32.mrf.mxu2  ;;  %v1838_v10 = vpop.f32.mrf.mxu3 }
  0xd5   : > { %v552_v40 = vpop.f32.mrf.mxu0  ;;  %v1781_v41 = vpop.f32.mrf.mxu1  ;;  %742 = vst [vmem:[%s1774_s23 + $0x100] sm:$0xff] %v1795_v56 }
  0xd6   : > { %711 = vst [vmem:[%s1774_s23 + $0x8] sm:$0xff] %v552_v40  ;;  %v774_v43 = vadd.f32 %v552_v40, %v550_v36  ;;  %v844_v44 = vmul.f32 %v552_v40, %v552_v40 }
  0xd7   : > { %727 = vst [vmem:[%s1774_s23 + $0x88] sm:$0xff] %v1781_v41 }
  0xd8   : > { %v907_v45 = vadd.f32 %v844_v44, %v843_v42  ;;  %758 = vst [vmem:[%s1774_s23 + $0x180] sm:$0xff] %v1838_v10 }
  0xdc   : > { %v1806_v62 = vpop.f32.mrf.mxu2  ;;  %v1851_v14 = vpop.f32.mrf.mxu3 }
  0xdd   : > { %v555_v46 = vpop.f32.mrf.mxu0  ;;  %v1786_v47 = vpop.f32.mrf.mxu1  ;;  %743 = vst [vmem:[%s1774_s23 + $0x108] sm:$0xff] %v1806_v62 }
  0xde   : > { %712 = vst [vmem:[%s1774_s23 + $0x10] sm:$0xff] %v555_v46  ;;  %v775_v48 = vadd.f32 %v774_v43, %v555_v46  ;;  %v845_v49 = vmul.f32 %v555_v46, %v555_v46 }
  0xdf   : > { %728 = vst [vmem:[%s1774_s23 + $0x90] sm:$0xff] %v1786_v47 }
  0xe0   : > { %v908_v50 = vadd.f32 %v907_v45, %v845_v49  ;;  %759 = vst [vmem:[%s1774_s23 + $0x188] sm:$0xff] %v1851_v14 }
  0xe4   : > { %v1818_v3 = vpop.f32.mrf.mxu2  ;;  %v1864_v18 = vpop.f32.mrf.mxu3 }
  0xe5   : > { %v557_v52 = vpop.f32.mrf.mxu0  ;;  %v1792_v53 = vpop.f32.mrf.mxu1  ;;  %744 = vst [vmem:[%s1774_s23 + $0x110] sm:$0xff] %v1818_v3 }
  0xe6   : > { %713 = vst [vmem:[%s1774_s23 + $0x18] sm:$0xff] %v557_v52  ;;  %v776_v54 = vadd.f32 %v775_v48, %v557_v52  ;;  %v846_v55 = vmul.f32 %v557_v52, %v557_v52 }
  0xe7   : > { %729 = vst [vmem:[%s1774_s23 + $0x98] sm:$0xff] %v1792_v53 }
  0xe8   : > { %v909_v57 = vadd.f32 %v908_v50, %v846_v55  ;;  %760 = vst [vmem:[%s1774_s23 + $0x190] sm:$0xff] %v1864_v18 }
  0xec   : > { %v1827_v6 = vpop.f32.mrf.mxu2  ;;  %v1877_v22 = vpop.f32.mrf.mxu3 }
  0xed   : > { %v560_v58 = vpop.f32.mrf.mxu0  ;;  %v1801_v59 = vpop.f32.mrf.mxu1  ;;  %745 = vst [vmem:[%s1774_s23 + $0x118] sm:$0xff] %v1827_v6 }
  0xee   : > { %714 = vst [vmem:[%s1774_s23 + $0x20] sm:$0xff] %v560_v58  ;;  %v1804_v60 = vadd.f32 %v776_v54, %v560_v58  ;;  %v847_v61 = vmul.f32 %v560_v58, %v560_v58 }
  0xef   : > { %730 = vst [vmem:[%s1774_s23 + $0xa0] sm:$0xff] %v1801_v59 }
  0xf0   : > { %v1810_v63 = vadd.f32 %v909_v57, %v847_v61  ;;  %761 = vst [vmem:[%s1774_s23 + $0x198] sm:$0xff] %v1877_v22 }
  0xf4   : > { %v1836_v9 = vpop.f32.mrf.mxu2  ;;  %v1890_v26 = vpop.f32.mrf.mxu3 }
  0xf5   : > { %v562_v1 = vpop.f32.mrf.mxu0  ;;  %v1815_v2 = vpop.f32.mrf.mxu1  ;;  %746 = vst [vmem:[%s1774_s23 + $0x120] sm:$0xff] %v1836_v9 }
  0xf6   : > { %715 = vst [vmem:[%s1774_s23 + $0x28] sm:$0xff] %v562_v1  ;;  %v848_v31 = vmul.f32 %v562_v1, %v562_v1  ;;  %v778_v32 = vadd.f32 %v1804_v60, %v562_v1 }
  0xf7   : > { %731 = vst [vmem:[%s1774_s23 + $0xa8] sm:$0xff] %v1815_v2 }
  0xf8   : > { %762 = vst [vmem:[%s1774_s23 + $0x1a0] sm:$0xff] %v1890_v26  ;;  %v911_v34 = vadd.f32 %v1810_v63, %v848_v31 }
  0xfc   : > { %v1849_v13 = vpop.f32.mrf.mxu2  ;;  %v1903_v30 = vpop.f32.mrf.mxu3 }
  0xfd   : > { %v565_v4 = vpop.f32.mrf.mxu0  ;;  %v1824_v5 = vpop.f32.mrf.mxu1  ;;  %747 = vst [vmem:[%s1774_s23 + $0x128] sm:$0xff] %v1849_v13 }
  0xfe   : > { %716 = vst [vmem:[%s1774_s23 + $0x30] sm:$0xff] %v565_v4  ;;  %v849_v33 = vmul.f32 %v565_v4, %v565_v4  ;;  %v779_v35 = vadd.f32 %v778_v32, %v565_v4 }
  0xff   : > { %732 = vst [vmem:[%s1774_s23 + $0xb0] sm:$0xff] %v1824_v5 }
 0x100   : > { %763 = vst [vmem:[%s1774_s23 + $0x1a8] sm:$0xff] %v1903_v30  ;;  %v912_v40 = vadd.f32 %v911_v34, %v849_v33 }
 0x104   : > { %v1862_v17 = vpop.f32.mrf.mxu2  ;;  %v1918_v45 = vpop.f32.mrf.mxu3 }
 0x105   : > { %v567_v7 = vpop.f32.mrf.mxu0  ;;  %v1833_v8 = vpop.f32.mrf.mxu1  ;;  %748 = vst [vmem:[%s1774_s23 + $0x130] sm:$0xff] %v1862_v17 }
 0x106   : > { %717 = vst [vmem:[%s1774_s23 + $0x38] sm:$0xff] %v567_v7  ;;  %v850_v36 = vmul.f32 %v567_v7, %v567_v7  ;;  %v780_v42 = vadd.f32 %v779_v35, %v567_v7 }
 0x107   : > { %733 = vst [vmem:[%s1774_s23 + $0xb8] sm:$0xff] %v1833_v8 }
 0x108   : > { %v913_v46 = vadd.f32 %v912_v40, %v850_v36  ;;  %764 = vst [vmem:[%s1774_s23 + $0x1b0] sm:$0xff] %v1918_v45 }
 0x10c   : > { %v1875_v21 = vpop.f32.mrf.mxu2  ;;  %v1931_v4 = vpop.f32.mrf.mxu3 }
 0x10d   : > { %v570_v11 = vpop.f32.mrf.mxu0  ;;  %v1846_v12 = vpop.f32.mrf.mxu1  ;;  %749 = vst [vmem:[%s1774_s23 + $0x138] sm:$0xff] %v1875_v21 }
 0x10e   : > { %718 = vst [vmem:[%s1774_s23 + $0x40] sm:$0xff] %v570_v11  ;;  %v851_v43 = vmul.f32 %v570_v11, %v570_v11  ;;  %v781_v48 = vadd.f32 %v780_v42, %v570_v11 }
 0x10f   : > { %734 = vst [vmem:[%s1774_s23 + $0xc0] sm:$0xff] %v1846_v12 }
 0x110   : > { %v914_v50 = vadd.f32 %v913_v46, %v851_v43  ;;  %765 = vst [vmem:[%s1774_s23 + $0x1b8] sm:$0xff] %v1931_v4 }
 0x114   : > { %v1888_v25 = vpop.f32.mrf.mxu2  ;;  %v1944_v43 = vpop.f32.mrf.mxu3 }
 0x115   : > { %v572_v15 = vpop.f32.mrf.mxu0  ;;  %v1859_v16 = vpop.f32.mrf.mxu1  ;;  %750 = vst [vmem:[%s1774_s23 + $0x140] sm:$0xff] %v1888_v25 }
 0x116   : > { %719 = vst [vmem:[%s1774_s23 + $0x48] sm:$0xff] %v572_v15  ;;  %v852_v49 = vmul.f32 %v572_v15, %v572_v15  ;;  %v782_v51 = vadd.f32 %v781_v48, %v572_v15 }
 0x117   : > { %735 = vst [vmem:[%s1774_s23 + $0xc8] sm:$0xff] %v1859_v16 }
 0x118   : > { %v915_v54 = vadd.f32 %v914_v50, %v852_v49  ;;  %766 = vst [vmem:[%s1774_s23 + $0x1c0] sm:$0xff] %v1944_v43  ;;  %v860_v49 = vmul.f32 %v1781_v41, %v1781_v41 }
 0x11c   : > { %v1901_v29 = vpop.f32.mrf.mxu2 }
 0x11d   : > { %v575_v19 = vpop.f32.mrf.mxu0  ;;  %v1872_v20 = vpop.f32.mrf.mxu1  ;;  %751 = vst [vmem:[%s1774_s23 + $0x148] sm:$0xff] %v1901_v29 }
 0x11e   : > { %720 = vst [vmem:[%s1774_s23 + $0x50] sm:$0xff] %v575_v19  ;;  %v853_v52 = vmul.f32 %v575_v19, %v575_v19  ;;  %v783_v55 = vadd.f32 %v782_v51, %v575_v19 }
 0x11f   : > { %736 = vst [vmem:[%s1774_s23 + $0xd0] sm:$0xff] %v1872_v20 }
 0x120   : > { %v916_v61 = vadd.f32 %v915_v54, %v853_v52  ;;  %v861_v52 = vmul.f32 %v1786_v47, %v1786_v47 }
 0x124   : > { %v1916_v44 = vpop.f32.mrf.mxu2 }
 0x125   : > { %v577_v23 = vpop.f32.mrf.mxu0  ;;  %v1885_v24 = vpop.f32.mrf.mxu1  ;;  %752 = vst [vmem:[%s1774_s23 + $0x150] sm:$0xff] %v1916_v44 }
 0x126   : > { %721 = vst [vmem:[%s1774_s23 + $0x58] sm:$0xff] %v577_v23  ;;  %v854_v57 = vmul.f32 %v577_v23, %v577_v23  ;;  %v784_v63 = vadd.f32 %v783_v55, %v577_v23 }
 0x127   : > { %737 = vst [vmem:[%s1774_s23 + $0xd8] sm:$0xff] %v1885_v24 }
 0x128   : > { %v917_v7 = vadd.f32 %v916_v61, %v854_v57 }
 0x12c   : > { %v1929_v1 = vpop.f32.mrf.mxu2 }
 0x12d   : > { %v580_v27 = vpop.f32.mrf.mxu0  ;;  %v1898_v28 = vpop.f32.mrf.mxu1  ;;  %753 = vst [vmem:[%s1774_s23 + $0x158] sm:$0xff] %v1929_v1 }
 0x12e   : > { %722 = vst [vmem:[%s1774_s23 + $0x60] sm:$0xff] %v580_v27  ;;  %v855_v0 = vmul.f32 %v580_v27, %v580_v27  ;;  %v785_v11 = vadd.f32 %v784_v63, %v580_v27  ;;  %v1966_v63 = vpop.f32.mrf.mxu3 }
 0x12f   : > { %738 = vst [vmem:[%s1774_s23 + $0xe0] sm:$0xff] %v1898_v28 }
 0x130   : > { %v918_v19 = vadd.f32 %v917_v7, %v855_v0  ;;  %767 = vst [vmem:[%s1774_s23 + $0x1c8] sm:$0xff] %v1966_v63 }
 0x134   : > { %v1942_v42 = vpop.f32.mrf.mxu2 }
 0x135   : > { %v582_v38 = vpop.f32.mrf.mxu0  ;;  %v1913_v39 = vpop.f32.mrf.mxu1  ;;  %754 = vst [vmem:[%s1774_s23 + $0x160] sm:$0xff] %v1942_v42 }
 0x136   : > { %723 = vst [vmem:[%s1774_s23 + $0x68] sm:$0xff] %v582_v38  ;;  %v856_v15 = vmul.f32 %v582_v38, %v582_v38  ;;  %v786_v31 = vadd.f32 %v785_v11, %v582_v38  ;;  %v859_v38 = vmul.f32 %v1772_v37, %v1772_v37 }
 0x137   : > { %739 = vst [vmem:[%s1774_s23 + $0xe8] sm:$0xff] %v1913_v39 }
 0x138   : > { %v919_v32 = vadd.f32 %v918_v19, %v856_v15  ;;  %v865_v15 = vmul.f32 %v1824_v5, %v1824_v5 }
 0x13c   : > { %v1964_v61 = vpop.f32.mrf.mxu2 }
 0x13d   : > { %v585_v58 = vpop.f32.mrf.mxu0  ;;  %v1926_v60 = vpop.f32.mrf.mxu1  ;;  %755 = vst [vmem:[%s1774_s23 + $0x168] sm:$0xff] %v1964_v61 }
 0x13e   : > { %724 = vst [vmem:[%s1774_s23 + $0x70] sm:$0xff] %v585_v58  ;;  %v857_v23 = vmul.f32 %v585_v58, %v585_v58  ;;  %v787_v33 = vadd.f32 %v786_v31, %v585_v58 }
 0x13f   : > { %740 = vst [vmem:[%s1774_s23 + $0xf0] sm:$0xff] %v1926_v60 }
 0x140   : > { %v920_v36 = vadd.f32 %v919_v32, %v857_v23  ;;  %v866_v23 = vmul.f32 %v1833_v8, %v1833_v8 }
 0x145   : > { %v587_v34 = vpop.f32.mrf.mxu0  ;;  %v1939_v35 = vpop.f32.mrf.mxu1 }
 0x146   : > { %725 = vst [vmem:[%s1774_s23 + $0x78] sm:$0xff] %v587_v34  ;;  %v788_v40 = vadd.f32 %v787_v33, %v587_v34  ;;  %v858_v27 = vmul.f32 %v587_v34, %v587_v34  ;;  %v1984_v33 = vpop.f32.mrf.mxu2  ;;  %v1986_v34 = vpop.f32.mrf.mxu3 }
 0x147   : > { %741 = vst [vmem:[%s1774_s23 + $0xf8] sm:$0xff] %v1939_v35 }
 0x148   : > { %v789_v46 = vadd.f32 %v788_v40, %v1772_v37  ;;  %v921_v48 = vadd.f32 %v920_v36, %v858_v27  ;;  %v862_v37 = vmul.f32 %v1792_v53, %v1792_v53  ;;  %756 = vst [vmem:[%s1774_s23 + $0x170] sm:$0xff] %v1984_v33 }
 0x149   : > { %768 = vst [vmem:[%s1774_s23 + $0x1d0] sm:$0xff] %v1986_v34 }
 0x14a   : > { %v790_v50 = vadd.f32 %v789_v46, %v1781_v41  ;;  %v922_v51 = vadd.f32 %v921_v48, %v859_v38  ;;  %v863_v41 = vmul.f32 %v1801_v59, %v1801_v59  ;;  %v869_v38 = vmul.f32 %v1872_v20, %v1872_v20 }
 0x14c   : > { %v791_v54 = vadd.f32 %v790_v50, %v1786_v47  ;;  %v923_v55 = vadd.f32 %v922_v51, %v860_v49  ;;  %v870_v49 = vmul.f32 %v1885_v24, %v1885_v24 }
 0x14e   : > { %v792_v57 = vadd.f32 %v791_v54, %v1792_v53  ;;  %v924_v58 = vadd.f32 %v923_v55, %v861_v52  ;;  %v864_v53 = vmul.f32 %v1815_v2, %v1815_v2  ;;  %v2004_v51 = vpop.f32.mrf.mxu2  ;;  %v2006_v52 = vpop.f32.mrf.mxu3  ;;  %v871_v54 = vmul.f32 %v1898_v28, %v1898_v28 }
 0x14f   : > { %757 = vst [vmem:[%s1774_s23 + $0x178] sm:$0xff] %v2004_v51 }
 0x150   : > { %v793_v0 = vadd.f32 %v792_v57, %v1801_v59  ;;  %v925_v47 = vadd.f32 %v924_v58, %v862_v37  ;;  %769 = vst [vmem:[%s1774_s23 + $0x1d8] sm:$0xff] %v2006_v52 }
 0x152   : > { %v794_v7 = vadd.f32 %v793_v0, %v1815_v2  ;;  %v926_v11 = vadd.f32 %v925_v47, %v863_v41  ;;  %v867_v2 = vmul.f32 %v1846_v12, %v1846_v12  ;;  %v873_v41 = vmul.f32 %v1926_v60, %v1926_v60 }
 0x154   : > { %v927_v19 = vadd.f32 %v926_v11, %v864_v53  ;;  %v795_v31 = vadd.f32 %v794_v7, %v1824_v5  ;;  %v868_v5 = vmul.f32 %v1859_v16, %v1859_v16 }
 0x156   : > { %v796_v59 = vadd.f32 %v795_v31, %v1833_v8  ;;  %v928_v32 = vadd.f32 %v927_v19, %v865_v15  ;;  %v2024_v53 = vpop.f32.mrf.mxu3 }
 0x157   : > { %770 = vst [vmem:[%s1774_s23 + $0x1e0] sm:$0xff] %v2024_v53 }
 0x158   : > { %v797_v36 = vadd.f32 %v796_v59, %v1846_v12  ;;  %v929_v40 = vadd.f32 %v928_v32, %v866_v23  ;;  %v878_v59 = vmul.f32 %v1827_v6, %v1827_v6 }
 0x15a   : > { %v798_v8 = vadd.f32 %v797_v36, %v1859_v16  ;;  %v930_v27 = vadd.f32 %v929_v40, %v867_v2 }
 0x15c   : > { %v799_v46 = vadd.f32 %v798_v8, %v1872_v20  ;;  %v931_v48 = vadd.f32 %v930_v27, %v868_v5 }
 0x15e   : > { %v800_v12 = vadd.f32 %v799_v46, %v1885_v24  ;;  %v932_v50 = vadd.f32 %v931_v48, %v869_v38  ;;  %v872_v24 = vmul.f32 %v1913_v39, %v1913_v39  ;;  %v2040_v2 = vpop.f32.mrf.mxu3  ;;  %v882_v46 = vmul.f32 %v1875_v21, %v1875_v21 }
 0x15f   : > { %771 = vst [vmem:[%s1774_s23 + $0x1e8] sm:$0xff] %v2040_v2 }
 0x160   : > { %v801_v16 = vadd.f32 %v800_v12, %v1898_v28  ;;  %v933_v20 = vadd.f32 %v932_v50, %v870_v49  ;;  %v874_v28 = vmul.f32 %v1939_v35, %v1939_v35 }
 0x162   : > { %v934_v55 = vadd.f32 %v933_v20, %v871_v54  ;;  %v802_v37 = vadd.f32 %v801_v16, %v1913_v39  ;;  %v875_v39 = vmul.f32 %v1795_v56, %v1795_v56  ;;  %v885_v54 = vmul.f32 %v1916_v44, %v1916_v44 }
 0x164   : > { %v935_v57 = vadd.f32 %v934_v55, %v872_v24  ;;  %v803_v58 = vadd.f32 %v802_v37, %v1926_v60  ;;  %v876_v60 = vmul.f32 %v1806_v62, %v1806_v62  ;;  %v886_v37 = vmul.f32 %v1929_v1, %v1929_v1 }
 0x166   : > { %v936_v0 = vadd.f32 %v935_v57, %v873_v41  ;;  %v804_v47 = vadd.f32 %v803_v58, %v1939_v35  ;;  %v877_v35 = vmul.f32 %v1818_v3, %v1818_v3  ;;  %v2057_v49 = vpop.f32.mrf.mxu3 }
 0x167   : > { %772 = vst [vmem:[%s1774_s23 + $0x1f0] sm:$0xff] %v2057_v49 }
 0x168   : > { %v805_v7 = vadd.f32 %v804_v47, %v1795_v56  ;;  %v937_v11 = vadd.f32 %v936_v0, %v874_v28 }
 0x16a   : > { %v806_v15 = vadd.f32 %v805_v7, %v1806_v62  ;;  %v938_v19 = vadd.f32 %v937_v11, %v875_v39  ;;  %v879_v62 = vmul.f32 %v1836_v9, %v1836_v9 }
 0x16c   : > { %v807_v31 = vadd.f32 %v806_v15, %v1818_v3  ;;  %v939_v23 = vadd.f32 %v938_v19, %v876_v60  ;;  %v880_v3 = vmul.f32 %v1849_v13, %v1849_v13 }
 0x16e   : > { %v808_v32 = vadd.f32 %v807_v31, %v1827_v6  ;;  %v940_v56 = vadd.f32 %v939_v23, %v877_v35  ;;  %v881_v6 = vmul.f32 %v1862_v17, %v1862_v17  ;;  %v2079_v57 = vpop.f32.mrf.mxu3 }
 0x16f   : > { %773 = vst [vmem:[%s1774_s23 + $0x1f8] sm:$0xff] %v2079_v57 }
 0x170   : > { %v809_v36 = vadd.f32 %v808_v32, %v1836_v9  ;;  %v941_v40 = vadd.f32 %v940_v56, %v878_v59 }
 0x172   : > { %v810_v5 = vadd.f32 %v809_v36, %v1849_v13  ;;  %v942_v8 = vadd.f32 %v941_v40, %v879_v62  ;;  %v883_v13 = vmul.f32 %v1888_v25, %v1888_v25 }
 0x174   : > { %v943_v27 = vadd.f32 %v942_v8, %v880_v3  ;;  %v811_v38 = vadd.f32 %v810_v5, %v1862_v17 }
 0x176   : > { %v812_v9 = vadd.f32 %v811_v38, %v1875_v21  ;;  %v944_v48 = vadd.f32 %v943_v27, %v881_v6  ;;  %v884_v21 = vmul.f32 %v1901_v29, %v1901_v29 }
 0x178   : > { %v813_v12 = vadd.f32 %v812_v9, %v1888_v25  ;;  %v945_v17 = vadd.f32 %v944_v48, %v882_v46 }
 0x17a   : > { %v814_v50 = vadd.f32 %v813_v12, %v1901_v29  ;;  %v946_v16 = vadd.f32 %v945_v17, %v883_v13 }
 0x17c   : > { %v815_v20 = vadd.f32 %v814_v50, %v1916_v44  ;;  %v947_v55 = vadd.f32 %v946_v16, %v884_v21  ;;  %v887_v44 = vmul.f32 %v1942_v42, %v1942_v42 }
 0x17e   : > { %v816_v25 = vadd.f32 %v815_v20, %v1929_v1  ;;  %v948_v24 = vadd.f32 %v947_v55, %v885_v54 }
 0x180   : > { %v949_v29 = vadd.f32 %v948_v24, %v886_v37  ;;  %v817_v58 = vadd.f32 %v816_v25, %v1942_v42 }
 0x181   : > { %1528 = shalt.err (!%p1525_p10)
}
 0x182   : > { %s1608_s25 = smov 128   ;;  %s1609_s18 = smov 8   ;;  %v950_v1 = vadd.f32 %v949_v29, %v887_v44  ;;  %v818_v42 = vadd.f32 %v817_v58, %v1964_v61  ;;  %v888_v41 = vmul.f32 %v1964_v61, %v1964_v61  ;;  %v889_v28 = vmul.f32 %v1984_v33, %v1984_v33 }
 0x183   : > { %1381 = dma.vmem_to_hbm [thread:$0]  (%p1699_p3), %s2074_s22, 8192, %s1000_s24, %s980_s29, %s1608_s25, %s1608_s25, %s1609_s18   ;;  %v890_v11 = vmul.f32 %v2004_v51, %v2004_v51  ;;  %v891_v60 = vmul.f32 %v1838_v10, %v1838_v10  ;;  %v892_v61 = vmul.f32 %v1851_v14, %v1851_v14  ;;  %v902_v17 = vmul.f32 %v2006_v52, %v2006_v52 }
 0x184   : > { %v951_v0 = vadd.f32 %v950_v1, %v888_v41  ;;  %v819_v47 = vadd.f32 %v818_v42, %v1984_v33  ;;  %v893_v33 = vmul.f32 %v1864_v18, %v1864_v18  ;;  %v903_v16 = vmul.f32 %v2024_v53, %v2024_v53  ;;  %s1141_s23 = sshll.u32 %s1729_s6, 1  ;;  %s1306_s27 = sshll.u32 %s1651_s16, 1 }
 0x185   : > { %s1012_s21 = scalar_lea.hbm %s2192_s3, %s1306_s27  ;;  %s218_s22 = scalar_lea.vmem [#allocation8], %s1141_s23  ;;  %vm976_vm0 = vcmask 1040384  }
 0x186   : > { %v952_v39 = vadd.f32 %v951_v0, %v889_v28  ;;  %v820_v7 = vadd.f32 %v819_v47, %v2004_v51  ;;  %v894_v51 = vmul.f32 %v1877_v22, %v1877_v22  ;;  %s1014_s24 = sshll.u32 %s218_s22, 4  ;;  %s1016_s29 = sshll.u32 %s1012_s21, 4  ;;  %s1015_s24 = int_to_ptr.vmem [resolvable:$true] %s1014_s24  ;;  %s1017_s29 = int_to_ptr.hbm [resolvable:$true] %s1016_s29 }
 0x187   : > { %s985_s16 = scalar_lea.sflag [#allocation9], %s1729_s6  ;;  %s1543_s30 = sshra.s32 %s1017_s29, 4  ;;  %s1544_s30 = int_to_ptr.hbm [resolvable:$true] %s1543_s30 }
 0x188   : > { %v821_v15 = vadd.f32 %v820_v7, %v1838_v10  ;;  %v953_v19 = vadd.f32 %v952_v39, %v890_v11  ;;  %v895_v10 = vmul.f32 %v1890_v26, %v1890_v26  ;;  %s1545_s7 = scalar_lea.hbm %s1544_s30, 2  ;;  %s1549_s10 = scalar_lea.hbm %s2192_s3, 4 }
 0x189   : > { %p1546_p12 = scmp.ne.s32.totalorder %s1544_s30, %s1545_s7  ;;  %p1550_p5 = scmp.lt.s32.totalorder %s1544_s30, %s2192_s3 }
 0x18a   : > { %v822_v35 = vadd.f32 %v821_v15, %v1851_v14  ;;  %v954_v31 = vadd.f32 %v953_v19, %v891_v60  ;;  %v896_v14 = vmul.f32 %v1903_v30, %v1903_v30  ;;  %p1551_p7 = scmp.lt.s32.totalorder %s1549_s10, %s1545_s7 }
 0x18b   : > { %p1547_p13 = pnand %p1546_p12, %p1699_p3 }
 0x18c   : > { %v823_v23 = vadd.f32 %v822_v35, %v1864_v18  ;;  %v955_v59 = vadd.f32 %v954_v31, %v892_v61  ;;  %v897_v18 = vmul.f32 %v1918_v45, %v1918_v45  ;;  %p1552_p1 = por %p1551_p7, %p1550_p5 }
 0x18d   : > { %p1548_p0 = pneg %p1547_p13 }
 0x18e   : > { %v824_v32 = vadd.f32 %v823_v23, %v1877_v22  ;;  %v956_v56 = vadd.f32 %v955_v59, %v893_v33  ;;  %v898_v22 = vmul.f32 %v1931_v4, %v1931_v4 }
 0x18f   : > { %p1553_p4 = pnand %p1552_p1, %p1548_p0 }
 0x190   : > { %v825_v62 = vadd.f32 %v824_v32, %v1890_v26  ;;  %v957_v36 = vadd.f32 %v956_v56, %v894_v51  ;;  %v899_v26 = vmul.f32 %v1944_v43, %v1944_v43 }
 0x192   : > { %v826_v40 = vadd.f32 %v825_v62, %v1903_v30  ;;  %v958_v3 = vadd.f32 %v957_v36, %v895_v10  ;;  %v900_v30 = vmul.f32 %v1966_v63, %v1966_v63 }
 0x194   : > { %v959_v5 = vadd.f32 %v958_v3, %v896_v14  ;;  %v827_v8 = vadd.f32 %v826_v40, %v1918_v45  ;;  %v901_v45 = vmul.f32 %v1986_v34, %v1986_v34 }
 0x196   : > { %v828_v6 = vadd.f32 %v827_v8, %v1931_v4  ;;  %v960_v27 = vadd.f32 %v959_v5, %v897_v18 }
 0x198   : > { %v829_v38 = vadd.f32 %v828_v6, %v1944_v43  ;;  %v961_v46 = vadd.f32 %v960_v27, %v898_v22 }
 0x19a   : > { %v830_v9 = vadd.f32 %v829_v38, %v1966_v63  ;;  %v962_v48 = vadd.f32 %v961_v46, %v899_v26 }
 0x19c   : > { %v831_v13 = vadd.f32 %v830_v9, %v1986_v34  ;;  %v963_v12 = vadd.f32 %v962_v48, %v900_v30  ;;  %v904_v34 = vmul.f32 %v2040_v2, %v2040_v2 }
 0x19e   : > { %v832_v4 = vadd.f32 %v831_v13, %v2006_v52  ;;  %v964_v21 = vadd.f32 %v963_v12, %v901_v45  ;;  %v905_v52 = vmul.f32 %v2057_v49, %v2057_v49 }
 0x1a0   : > { %v965_v43 = vadd.f32 %v964_v21, %v902_v17  ;;  %v833_v50 = vadd.f32 %v832_v4, %v2024_v53  ;;  %v906_v53 = vmul.f32 %v2079_v57, %v2079_v57 }
 0x1a2   : > { %v966_v63 = vadd.f32 %v965_v43, %v903_v16  ;;  %v834_v54 = vadd.f32 %v833_v50, %v2040_v2 }
 0x1a4   : > { %v967_v20 = vadd.f32 %v966_v63, %v904_v34  ;;  %v835_v55 = vadd.f32 %v834_v54, %v2057_v49 }
 0x1a6   : > { %v968_v25 = vadd.f32 %v967_v20, %v905_v52  ;;  %v836_v37 = vadd.f32 %v835_v55, %v2079_v57 }
 0x1a8   : > { %v837_v24 = vrot.slane %v836_v37, 4  ;;  %v969_v29 = vadd.f32 %v968_v25, %v906_v53 }
 0x1aa   : > { %v838_v58 = vadd.f32 %v837_v24, %v836_v37  ;;  %v970_v44 = vrot.slane %v969_v29, 4 }
 0x1ac   : > { %v839_v1 = vrot.slane %v838_v58, 2  ;;  %v971_v42 = vadd.f32 %v970_v44, %v969_v29 }
 0x1ae   : > { %v840_v2 = vadd.f32 %v839_v1, %v838_v58  ;;  %v972_v41 = vrot.slane %v971_v42, 2 }
 0x1b0   : > { %v841_v49 = vrot.slane %v840_v2, 1  ;;  %v973_v0 = vadd.f32 %v972_v41, %v971_v42 }
 0x1b2   : > { %v974_v47 = vrot.slane %v973_v0, 1  ;;  %v842_v57 = vadd.f32 %v841_v49, %v840_v2 }
 0x1b4   : > { %v975_v28 = vadd.f32 %v974_v47, %v973_v0 }
 0x1b6   : > { %v977_v39 = vsel %vm976_vm0, %v842_v57, %v975_v28 }
 0x1b7   : > { %978 = vst [vmem:[%s218_s22] sm:$0x3] %v977_v39 }
 0x1b8   : > { %1556 = shalt.err (!%p1553_p4)
}
 0x1b9   : > { %1382 = dma.vmem_to_hbm [thread:$0]  (%p1699_p3), %s1015_s24, 32, %s1017_s29, %s985_s16  }
 0x1ba PF: > { %s1028_s6 = sand.u32 1, %s1591_s12   ;;  %p2198_p8 = scmp.ge.s32.totalorder %s1603_s15, 2 }
 0x1bb   : > { %s1029_s25 = scalar_lea.sflag [#allocation4], %s1028_s6 }
 0x1bc   : > { %p1394_p11 = pnand %p2198_p8, %p1665_p6 }
 0x1be   : > { %p1395_p9 = pneg %p1394_p11 }
 0x1c0   : > { %1582 = dma.done.wait (%p1395_p9), %s1029_s25, 8192  }
 0x1c1   : > { %1584 = vsyncadd (%p1395_p9), %s1029_s25, 4294959104  ;;  %s1039_s18 = scalar_lea.sflag [#allocation9], %s1028_s6 }
 0x1c2   : > { %1586 = dma.done.wait (%p1395_p9), %s1039_s18, 32  }
 0x1c3   : > { %1588 = vsyncadd (%p1395_p9), %s1039_s18, 4294967264  ;;  %p21_p3 = scmp.ge.s32.totalorder %s1683_s26, 4   ;;  %s2199_s12 = smov %s1595_s13 }
 0x1c4   : > { %s2200_s13 = smov %s1599_s14  ;;  %s2201_s14 = smov %s1695_s4 }
 0x1c5   : > { %s2202_s15 = smov %s1683_s26  ;;  %23 = sbr.rel (!%p21_p3) target bundleno = 8 (0x8), region = 94 }
 0x1ca   :  { %1045 = vsyncpa [#allocation3], 1 }
 0x1cb   :  { %1047 = vsyncpa [#allocation3 + $0x1], 1 }
 0x1cc   :  { %1048 = vsyncpa [#allocation6], 1 }
 0x1cd   :  { %1049 = vsyncpa [#allocation4], 1 }
 0x1ce   :  { %1051 = vsyncpa [#allocation4 + $0x1], 1 }
 0x1cf   :  { %1052 = vsyncpa [#allocation9], 1 }
 0x1d0   :  { %1054 = vsyncpa [#allocation9 + $0x1], 1 }

</bundles_post_ra>
